<compile_context>
chip_gen: v5e
topology: v5e:2x2
jax: 0.10.0
libtpu: 0.0.40
codegen_flags: <defaults>
</compile_context>

<pallas_src>
import math

import jax
import jax.numpy as jnp
from jax.experimental import pallas as pl
from jax.experimental.pallas import tpu as pltpu

# ---- synthetic "database" configuration (stands in for database.*) ----
FEATURE_SIZE = 64            # database.config.feature_size
SCHEMA_SIZE = 24             # database.schema.size
JOIN_DIM = SCHEMA_SIZE * 4   # join_matrix_embeddings second dim
OUT_DIM = 1                  # PredictTail(out_dim=1)
LANE = 128                   # rows packed per 128-lane output row


def _round_up(x, m):
    return (x + m - 1) // m * m


# ------------------------------- kernel ------------------------------------

def predict_tail_kernel(g_ref, js_ref, par_ref, left_ref, right_ref,
                        w_et_ref, b_et_ref, w_res_ref, wj_ref,
                        w_pa_ref, w_pb_ref, w_pc_ref, b_p1_ref,
                        w_par_ref, b1_ref, w2_ref, b2_ref, out_ref):
    f32 = jnp.float32

    # parent chain: relu([p|l|r] @ W_p1 + b_p1) @ (W_p2 @ W_t1_par)
    p1 = jnp.maximum(
        jnp.dot(par_ref[...], w_pa_ref[...], preferred_element_type=f32)
        + jnp.dot(left_ref[...], w_pb_ref[...], preferred_element_type=f32)
        + jnp.dot(right_ref[...], w_pc_ref[...], preferred_element_type=f32)
        + b_p1_ref[...],
        0.0)                                                     # [TB, F]
    par_term = jnp.dot(p1, w_par_ref[...], preferred_element_type=f32)

    # g chain: relu(g @ W_et + b_et) @ W_t1_res   (batch TB or 1 -> broadcasts)
    res0 = jnp.maximum(
        jnp.dot(g_ref[...], w_et_ref[...], preferred_element_type=f32)
        + b_et_ref[...],
        0.0)
    res_term = jnp.dot(res0, w_res_ref[...], preferred_element_type=f32)

    # joins (already scaled by 1/extra) through join_emb^T @ W_t1_mat
    jm_term = jnp.dot(js_ref[...], wj_ref[...], preferred_element_type=f32)

    # tail hidden
    h = jnp.maximum(res_term + jm_term + par_term + b1_ref[...], 0.0)  # [TB, F]

    # stage 2: pack 128 rows' scalar outputs into each 128-lane output row.
    w2 = w2_ref[...]                       # [1, F]
    b2 = b2_ref[...]                       # [1, 1]
    n_rows = out_ref.shape[0]              # tile_b // 128 (static)
    for j in range(n_rows):
        hj = h[j * LANE:(j + 1) * LANE, :]                       # [128, F]
        row = jax.lax.dot_general(
            w2, hj, (((1,), (1,)), ((), ())),
            preferred_element_type=f32)                          # [1, 128]
        out_ref[pl.ds(j, 1), :] = (row + b2).astype(out_ref.dtype)


# ------------------------------- wrapper ------------------------------------

def predict_tail(g, extra, parent_emb, left_emb, right_emb, joins, params,
                 *, out_dim=OUT_DIM, tile_b=None):
    # TODO(synk): packed output path assumes the module default out_dim=1.
    assert out_dim == 1, "only the default out_dim=1 path is lowered"
    F = FEATURE_SIZE

    def _2d(x):
        x = jnp.asarray(x, jnp.float32)
        return x[None] if x.ndim == 1 else x

    g = _2d(g)
    joins = _2d(joins)
    parent_emb = _2d(parent_emb)
    left_emb = _2d(left_emb)
    right_emb = _2d(right_emb)

    B = parent_emb.shape[0]
    assert left_emb.shape[0] == B and right_emb.shape[0] == B
    assert g.shape[0] in (1, B) and joins.shape[0] in (1, B)

    # Fold 1/extra into joins before the matmul (exact: a per-row scalar
    # commutes with the linear map).  Caller guarantees extra != 0 for real
    # rows (padded rows never see a divide).
    extra = jnp.asarray(extra, jnp.float32)
    if extra.ndim == 0:
        extra = extra.reshape(1, 1)
    elif extra.ndim == 1:
        extra = extra[:, None]
    joins_scaled = joins * (1.0 / extra)               # (1|B, JOIN_DIM)
    assert joins_scaled.shape[0] in (1, B)

    # ---- exact weight folding (once, outside the kernel) ----
    w_et, b_et = params['w_et'], params['b_et']        # [F,F], [F]
    w_p1, b_p1 = params['w_p1'], params['b_p1']        # [3F,F], [F]
    w_p2, b_p2 = params['w_p2'], params['b_p2']        # [F,F], [F]
    join_emb = params['join_emb']                      # [F, JOIN_DIM]
    w_t1, b_t1 = params['w_t1'], params['b_t1']        # [3F,F], [F]
    w_t2, b_t2 = params['w_t2'], params['b_t2']        # [F,1], [1]

    w_t1_res, w_t1_mat, w_t1_par = w_t1[:F], w_t1[F:2 * F], w_t1[2 * F:]
    w_pa, w_pb, w_pc = w_p1[:F], w_p1[F:2 * F], w_p1[2 * F:]

    wj = join_emb.T @ w_t1_mat                         # [JOIN_DIM, F]
    w_par = w_p2 @ w_t1_par                            # [F, F]
    b1 = (b_t1 + b_p2 @ w_t1_par)[None]                # [1, F]
    b_et2 = b_et[None]                                 # [1, F]
    b_p12 = b_p1[None]                                 # [1, F]
    w2 = w_t2.T                                        # [1, F]
    b2 = b_t2.reshape(1, 1)                            # [1, 1]

    # ---- batch tiling ----
    if tile_b is None:
        if B <= 1024:
            tile_b = _round_up(B, LANE)    # single grid step
        elif B >= 8192:
            tile_b = 2048                  # still < ~6 MiB double-buffered VMEM
        else:
            tile_b = 1024                  # >=2 parallel steps -> v7x megacore
    Bp = _round_up(B, tile_b)
    assert tile_b % LANE == 0
    # packed output block (tile_b//128, 128) must be (8,128)-tileable or cover
    # the whole output array.
    assert Bp == tile_b or tile_b % 1024 == 0

    def pad_rows(x):
        return jnp.pad(x, ((0, Bp - x.shape[0]), (0, 0))) if x.shape[0] != Bp else x

    parent_emb = pad_rows(parent_emb)
    left_emb = pad_rows(left_emb)
    right_emb = pad_rows(right_emb)

    def row_spec(x, width):
        if x.shape[0] == 1:
            # batch-1 input: constant block index -> one VMEM tile reused for
            # every grid step, no HBM-side broadcast materialisation.
            return x, pl.BlockSpec((1, width), lambda i: (0, 0))
        return pad_rows(x), pl.BlockSpec((tile_b, width), lambda i: (i, 0))

    g, g_spec = row_spec(g, F)
    joins_scaled, js_spec = row_spec(joins_scaled, JOIN_DIM)

    def batched_spec(width):
        return pl.BlockSpec((tile_b, width), lambda i: (i, 0))

    def const_spec(arr):
        return pl.BlockSpec(tuple(arr.shape), lambda i: (0,) * arr.ndim)

    weights = (w_et, b_et2, w_t1_res, wj, w_pa, w_pb, w_pc, b_p12,
               w_par, b1, w2, b2)

    out_packed = pl.pallas_call(
        predict_tail_kernel,
        out_shape=jax.ShapeDtypeStruct((Bp // LANE, LANE), jnp.float32),
        grid_spec=pltpu.PrefetchScalarGridSpec(
            num_scalar_prefetch=0,
            grid=(Bp // tile_b,),
            in_specs=[g_spec, js_spec,
                      batched_spec(F), batched_spec(F), batched_spec(F)]
                     + [const_spec(w) for w in weights],
            out_specs=pl.BlockSpec((tile_b // LANE, LANE), lambda i: (i, 0)),
        ),
        compiler_params=pltpu.CompilerParams(
            dimension_semantics=("parallel",)),
    )(g, joins_scaled, parent_emb, left_emb, right_emb, *weights)

    # row r of the batch lives at out_packed[r // 128, r % 128]
    return out_packed.reshape(-1)[:B, None]


# ----------------------------- parameters -----------------------------------

def init_params(key, out_dim=OUT_DIM):
    F = FEATURE_SIZE

    def lin(k, fan_in, fan_out):
        kw, kb = jax.random.split(k)
        bound = 1.0 / math.sqrt(fan_in)
        w = jax.random.uniform(kw, (fan_in, fan_out), jnp.float32, -bound, bound)
        b = jax.random.uniform(kb, (fan_out,), jnp.float32, -bound, bound)
        return w, b

    ks = jax.random.split(key, 6)
    w_et, b_et = lin(ks[0], F, F)                   # embedding_tail Linear
    w_p1, b_p1 = lin(ks[1], 3 * F, F)               # parent_fc[0]
    w_p2, b_p2 = lin(ks[2], F, F)                   # parent_fc[2]
    jb = 1.0 / math.sqrt(JOIN_DIM)
    join_emb = jax.random.uniform(ks[3], (F, JOIN_DIM), jnp.float32, -jb, jb)
    w_t1, b_t1 = lin(ks[4], 3 * F, F)               # tail[0]
    w_t2, b_t2 = lin(ks[5], F, out_dim)             # tail[2]

    return dict(w_et=w_et, b_et=b_et, w_p1=w_p1, b_p1=b_p1, w_p2=w_p2,
                b_p2=b_p2, join_emb=join_emb, w_t1=w_t1, b_t1=b_t1,
                w_t2=w_t2, b_t2=b_t2)


# --------------------------- pure-JAX reference -----------------------------

def predict_tail_ref(g, extra, parent_emb, left_emb, right_emb, joins, p):
    pcat = jnp.concatenate([parent_emb, left_emb, right_emb], axis=-1)
    p1 = jax.nn.relu(pcat @ p['w_p1'] + p['b_p1'])
    parent = p1 @ p['w_p2'] + p['b_p2']
    res = jax.nn.relu(g @ p['w_et'] + p['b_et'])
    matrix = (p['join_emb'][None] * joins[:, None, :]).sum(-1) / extra
    cat = jnp.concatenate([res, matrix, parent], axis=-1)
    t1 = jax.nn.relu(cat @ p['w_t1'] + p['b_t1'])
    return t1 @ p['w_t2'] + p['b_t2']


# ---------------------------------- main ------------------------------------

if __name__ == "__main__":
    key = jax.random.PRNGKey(0)
    kp, kd = jax.random.split(key)
    params = init_params(kp)
    F = FEATURE_SIZE

    # ---- test 1: small fully-batched case (single grid step) ----
    B = 16
    ks = jax.random.split(kd, 6)
    g = jax.random.normal(ks[0], (B, F), jnp.float32)
    parent_emb = jax.random.normal(ks[1], (B, F), jnp.float32)
    left_emb = jax.random.normal(ks[2], (B, F), jnp.float32)
    right_emb = jax.random.normal(ks[3], (B, F), jnp.float32)
    joins = (jax.random.uniform(ks[4], (B, JOIN_DIM)) < 0.25).astype(jnp.float32)
    extra = jnp.maximum(joins.sum(axis=-1, keepdims=True), 1.0)

    out = predict_tail(g, extra, parent_emb, left_emb, right_emb, joins, params)
    jax.block_until_ready(out)
    ref = predict_tail_ref(g, extra, parent_emb, left_emb, right_emb, joins, params)
    assert out.shape == (B, OUT_DIM), out.shape
    assert bool(jnp.all(jnp.isfinite(out)))
    assert jnp.allclose(out, ref, rtol=1e-3, atol=1e-3), \
        f"test1 max abs diff {float(jnp.max(jnp.abs(out - ref)))}"

    # ---- test 2: larger batch exercising multi-step grid + padding ----
    B2 = 1500
    k2 = jax.random.split(ks[5], 6)
    g2 = jax.random.normal(k2[0], (B2, F), jnp.float32)
    p2 = jax.random.normal(k2[1], (B2, F), jnp.float32)
    l2 = jax.random.normal(k2[2], (B2, F), jnp.float32)
    r2 = jax.random.normal(k2[3], (B2, F), jnp.float32)
    j2 = (jax.random.uniform(k2[4], (B2, JOIN_DIM)) < 0.25).astype(jnp.float32)
    e2 = jnp.maximum(j2.sum(axis=-1, keepdims=True), 1.0)

    out2 = predict_tail(g2, e2, p2, l2, r2, j2, params)
    jax.block_until_ready(out2)
    ref2 = predict_tail_ref(g2, e2, p2, l2, r2, j2, params)
    assert out2.shape == (B2, OUT_DIM)
    assert jnp.allclose(out2, ref2, rtol=1e-3, atol=1e-3), \
        f"test2 max abs diff {float(jnp.max(jnp.abs(out2 - ref2)))}"

    # ---- test 3: batch-1 g / joins (torch repeat-to-batch path) ----
    B3 = 8
    k3 = jax.random.split(k2[5], 5)
    g3 = jax.random.normal(k3[0], (F,), jnp.float32)               # 1-D g
    p3 = jax.random.normal(k3[1], (B3, F), jnp.float32)
    l3 = jax.random.normal(k3[2], (B3, F), jnp.float32)
    r3 = jax.random.normal(k3[3], (B3, F), jnp.float32)
    j3 = (jax.random.uniform(k3[4], (JOIN_DIM,)) < 0.25).astype(jnp.float32)
    e3 = 4.0                                                        # scalar extra

    out3 = predict_tail(g3, e3, p3, l3, r3, j3, params)
    jax.block_until_ready(out3)
    ref3 = predict_tail_ref(jnp.broadcast_to(g3[None], (B3, F)),
                            jnp.full((B3, 1), e3, jnp.float32),
                            p3, l3, r3,
                            jnp.broadcast_to(j3[None], (B3, JOIN_DIM)), params)
    assert out3.shape == (B3, OUT_DIM)
    assert jnp.allclose(out3, ref3, rtol=1e-3, atol=1e-3), \
        f"test3 max abs diff {float(jnp.max(jnp.abs(out3 - ref3)))}"

    print("KERNEL_OK")
</pallas_src>

<mosaic_0001>
module attributes {stable_mosaic.version = 11 : i64} {
  func.func @predict_tail_kernel(%arg0: i32, %arg1: memref<128x64xf32, #tpu.memory_space<vmem>>, %arg2: memref<128x96xf32, #tpu.memory_space<vmem>>, %arg3: memref<128x64xf32, #tpu.memory_space<vmem>>, %arg4: memref<128x64xf32, #tpu.memory_space<vmem>>, %arg5: memref<128x64xf32, #tpu.memory_space<vmem>>, %arg6: memref<64x64xf32, #tpu.memory_space<vmem>>, %arg7: memref<1x64xf32, #tpu.memory_space<vmem>>, %arg8: memref<64x64xf32, #tpu.memory_space<vmem>>, %arg9: memref<96x64xf32, #tpu.memory_space<vmem>>, %arg10: memref<64x64xf32, #tpu.memory_space<vmem>>, %arg11: memref<64x64xf32, #tpu.memory_space<vmem>>, %arg12: memref<64x64xf32, #tpu.memory_space<vmem>>, %arg13: memref<1x64xf32, #tpu.memory_space<vmem>>, %arg14: memref<64x64xf32, #tpu.memory_space<vmem>>, %arg15: memref<1x64xf32, #tpu.memory_space<vmem>>, %arg16: memref<1x64xf32, #tpu.memory_space<vmem>>, %arg17: memref<1x1xf32, #tpu.memory_space<vmem>>, %arg18: memref<1x128xf32, #tpu.memory_space<vmem>>) attributes {dimension_semantics = [#tpu.dimension_semantics<parallel>], iteration_bounds = array<i64: 1>, scalar_prefetch = 0 : i64, scratch_operands = 0 : i64, tpu.core_type = #tpu.core_type<tc>, window_params = [{transform_indices = @transform_0, window_bounds = array<i64: 128, 64>}, {transform_indices = @transform_1, window_bounds = array<i64: 128, 96>}, {transform_indices = @transform_2, window_bounds = array<i64: 128, 64>}, {transform_indices = @transform_3, window_bounds = array<i64: 128, 64>}, {transform_indices = @transform_4, window_bounds = array<i64: 128, 64>}, {pipeline_mode = #tpu.pipeline_mode<synchronous>, transform_indices = @transform_5, window_bounds = array<i64: 64, 64>}, {pipeline_mode = #tpu.pipeline_mode<synchronous>, transform_indices = @transform_6, window_bounds = array<i64: 1, 64>}, {pipeline_mode = #tpu.pipeline_mode<synchronous>, transform_indices = @transform_7, window_bounds = array<i64: 64, 64>}, {pipeline_mode = #tpu.pipeline_mode<synchronous>, transform_indices = @transform_8, window_bounds = array<i64: 96, 64>}, {pipeline_mode = #tpu.pipeline_mode<synchronous>, transform_indices = @transform_9, window_bounds = array<i64: 64, 64>}, {pipeline_mode = #tpu.pipeline_mode<synchronous>, transform_indices = @transform_10, window_bounds = array<i64: 64, 64>}, {pipeline_mode = #tpu.pipeline_mode<synchronous>, transform_indices = @transform_11, window_bounds = array<i64: 64, 64>}, {pipeline_mode = #tpu.pipeline_mode<synchronous>, transform_indices = @transform_12, window_bounds = array<i64: 1, 64>}, {pipeline_mode = #tpu.pipeline_mode<synchronous>, transform_indices = @transform_13, window_bounds = array<i64: 64, 64>}, {pipeline_mode = #tpu.pipeline_mode<synchronous>, transform_indices = @transform_14, window_bounds = array<i64: 1, 64>}, {pipeline_mode = #tpu.pipeline_mode<synchronous>, transform_indices = @transform_15, window_bounds = array<i64: 1, 64>}, {pipeline_mode = #tpu.pipeline_mode<synchronous>, transform_indices = @transform_16, window_bounds = array<i64: 1, 1>}, {transform_indices = @transform_17, window_bounds = array<i64: 1, 128>}]} {
    %c0 = arith.constant 0 : index
    %c0_0 = arith.constant 0 : index
    %0 = vector.load %arg3[%c0, %c0_0] : memref<128x64xf32, #tpu.memory_space<vmem>>, vector<128x64xf32>
    %c0_1 = arith.constant 0 : index
    %c0_2 = arith.constant 0 : index
    %1 = vector.load %arg10[%c0_1, %c0_2] : memref<64x64xf32, #tpu.memory_space<vmem>>, vector<64x64xf32>
    %cst = arith.constant dense<0.000000e+00> : vector<128x64xf32>
    %2 = tpu.matmul %0, %1, %cst {dimension_numbers = #tpu.dot_dimension_numbers<[1], [0], [0], [1], [0, 0, 1, 1], [], []>} : vector<128x64xf32>, vector<64x64xf32>, vector<128x64xf32> -> vector<128x64xf32>
    %c0_3 = arith.constant 0 : index
    %c0_4 = arith.constant 0 : index
    %3 = vector.load %arg4[%c0_3, %c0_4] : memref<128x64xf32, #tpu.memory_space<vmem>>, vector<128x64xf32>
    %c0_5 = arith.constant 0 : index
    %c0_6 = arith.constant 0 : index
    %4 = vector.load %arg11[%c0_5, %c0_6] : memref<64x64xf32, #tpu.memory_space<vmem>>, vector<64x64xf32>
    %cst_7 = arith.constant dense<0.000000e+00> : vector<128x64xf32>
    %5 = tpu.matmul %3, %4, %cst_7 {dimension_numbers = #tpu.dot_dimension_numbers<[1], [0], [0], [1], [0, 0, 1, 1], [], []>} : vector<128x64xf32>, vector<64x64xf32>, vector<128x64xf32> -> vector<128x64xf32>
    %6 = arith.addf %2, %5 : vector<128x64xf32>
    %c0_8 = arith.constant 0 : index
    %c0_9 = arith.constant 0 : index
    %7 = vector.load %arg5[%c0_8, %c0_9] : memref<128x64xf32, #tpu.memory_space<vmem>>, vector<128x64xf32>
    %c0_10 = arith.constant 0 : index
    %c0_11 = arith.constant 0 : index
    %8 = vector.load %arg12[%c0_10, %c0_11] : memref<64x64xf32, #tpu.memory_space<vmem>>, vector<64x64xf32>
    %cst_12 = arith.constant dense<0.000000e+00> : vector<128x64xf32>
    %9 = tpu.matmul %7, %8, %cst_12 {dimension_numbers = #tpu.dot_dimension_numbers<[1], [0], [0], [1], [0, 0, 1, 1], [], []>} : vector<128x64xf32>, vector<64x64xf32>, vector<128x64xf32> -> vector<128x64xf32>
    %10 = arith.addf %6, %9 : vector<128x64xf32>
    %c0_13 = arith.constant 0 : index
    %c0_14 = arith.constant 0 : index
    %11 = vector.load %arg13[%c0_13, %c0_14] : memref<1x64xf32, #tpu.memory_space<vmem>>, vector<1x64xf32>
    %12 = vector.broadcast %11 : vector<1x64xf32> to vector<128x64xf32>
    %13 = arith.addf %10, %12 : vector<128x64xf32>
    %cst_15 = arith.constant 0.000000e+00 : f32
    %14 = vector.broadcast %cst_15 : f32 to vector<128x64xf32>
    %15 = arith.maximumf %13, %14 : vector<128x64xf32>
    %c0_16 = arith.constant 0 : index
    %c0_17 = arith.constant 0 : index
    %16 = vector.load %arg14[%c0_16, %c0_17] : memref<64x64xf32, #tpu.memory_space<vmem>>, vector<64x64xf32>
    %cst_18 = arith.constant dense<0.000000e+00> : vector<128x64xf32>
    %17 = tpu.matmul %15, %16, %cst_18 {dimension_numbers = #tpu.dot_dimension_numbers<[1], [0], [0], [1], [0, 0, 1, 1], [], []>} : vector<128x64xf32>, vector<64x64xf32>, vector<128x64xf32> -> vector<128x64xf32>
    %c0_19 = arith.constant 0 : index
    %c0_20 = arith.constant 0 : index
    %18 = vector.load %arg1[%c0_19, %c0_20] : memref<128x64xf32, #tpu.memory_space<vmem>>, vector<128x64xf32>
    %c0_21 = arith.constant 0 : index
    %c0_22 = arith.constant 0 : index
    %19 = vector.load %arg6[%c0_21, %c0_22] : memref<64x64xf32, #tpu.memory_space<vmem>>, vector<64x64xf32>
    %cst_23 = arith.constant dense<0.000000e+00> : vector<128x64xf32>
    %20 = tpu.matmul %18, %19, %cst_23 {dimension_numbers = #tpu.dot_dimension_numbers<[1], [0], [0], [1], [0, 0, 1, 1], [], []>} : vector<128x64xf32>, vector<64x64xf32>, vector<128x64xf32> -> vector<128x64xf32>
    %c0_24 = arith.constant 0 : index
    %c0_25 = arith.constant 0 : index
    %21 = vector.load %arg7[%c0_24, %c0_25] : memref<1x64xf32, #tpu.memory_space<vmem>>, vector<1x64xf32>
    %22 = vector.broadcast %21 : vector<1x64xf32> to vector<128x64xf32>
    %23 = arith.addf %20, %22 : vector<128x64xf32>
    %cst_26 = arith.constant 0.000000e+00 : f32
    %24 = vector.broadcast %cst_26 : f32 to vector<128x64xf32>
    %25 = arith.maximumf %23, %24 : vector<128x64xf32>
    %c0_27 = arith.constant 0 : index
    %c0_28 = arith.constant 0 : index
    %26 = vector.load %arg8[%c0_27, %c0_28] : memref<64x64xf32, #tpu.memory_space<vmem>>, vector<64x64xf32>
    %cst_29 = arith.constant dense<0.000000e+00> : vector<128x64xf32>
    %27 = tpu.matmul %25, %26, %cst_29 {dimension_numbers = #tpu.dot_dimension_numbers<[1], [0], [0], [1], [0, 0, 1, 1], [], []>} : vector<128x64xf32>, vector<64x64xf32>, vector<128x64xf32> -> vector<128x64xf32>
    %c0_30 = arith.constant 0 : index
    %c0_31 = arith.constant 0 : index
    %28 = vector.load %arg2[%c0_30, %c0_31] : memref<128x96xf32, #tpu.memory_space<vmem>>, vector<128x96xf32>
    %c0_32 = arith.constant 0 : index
    %c0_33 = arith.constant 0 : index
    %29 = vector.load %arg9[%c0_32, %c0_33] : memref<96x64xf32, #tpu.memory_space<vmem>>, vector<96x64xf32>
    %cst_34 = arith.constant dense<0.000000e+00> : vector<128x64xf32>
    %30 = tpu.matmul %28, %29, %cst_34 {dimension_numbers = #tpu.dot_dimension_numbers<[1], [0], [0], [1], [0, 0, 1, 1], [], []>} : vector<128x96xf32>, vector<96x64xf32>, vector<128x64xf32> -> vector<128x64xf32>
    %31 = arith.addf %27, %30 : vector<128x64xf32>
    %32 = arith.addf %31, %17 : vector<128x64xf32>
    %c0_35 = arith.constant 0 : index
    %c0_36 = arith.constant 0 : index
    %33 = vector.load %arg15[%c0_35, %c0_36] : memref<1x64xf32, #tpu.memory_space<vmem>>, vector<1x64xf32>
    %34 = vector.broadcast %33 : vector<1x64xf32> to vector<128x64xf32>
    %35 = arith.addf %32, %34 : vector<128x64xf32>
    %cst_37 = arith.constant 0.000000e+00 : f32
    %36 = vector.broadcast %cst_37 : f32 to vector<128x64xf32>
    %37 = arith.maximumf %35, %36 : vector<128x64xf32>
    %c0_38 = arith.constant 0 : index
    %c0_39 = arith.constant 0 : index
    %38 = vector.load %arg16[%c0_38, %c0_39] : memref<1x64xf32, #tpu.memory_space<vmem>>, vector<1x64xf32>
    %c0_40 = arith.constant 0 : index
    %c0_41 = arith.constant 0 : index
    %39 = vector.load %arg17[%c0_40, %c0_41] : memref<1x1xf32, #tpu.memory_space<vmem>>, vector<1x1xf32>
    %cst_42 = arith.constant dense<0.000000e+00> : vector<1x128xf32>
    %40 = tpu.matmul %38, %37, %cst_42 {dimension_numbers = #tpu.dot_dimension_numbers<[1], [1], [0], [0], [0, 0, 1, 0], [], []>} : vector<1x64xf32>, vector<128x64xf32>, vector<1x128xf32> -> vector<1x128xf32>
    %41 = vector.broadcast %39 : vector<1x1xf32> to vector<1x128xf32>
    %42 = arith.addf %40, %41 : vector<1x128xf32>
    %c0_43 = arith.constant 0 : index
    %c0_44 = arith.constant 0 : index
    %43 = vector.load %arg18[%c0_43, %c0_44] : memref<1x128xf32, #tpu.memory_space<vmem>>, vector<1x128xf32>
    tpu.vector_store %arg18[%c0_43, %c0_44], %42 {strides = array<i32>} : memref<1x128xf32, #tpu.memory_space<vmem>>, vector<1x128xf32>,
    return
  }
  func.func @transform_0(%arg0: i32) -> (i32, i32) {
    %c0_i32 = arith.constant 0 : i32
    %c0_i32_0 = arith.constant 0 : i32
    return %arg0, %c0_i32 : i32, i32
  }
  func.func @transform_1(%arg0: i32) -> (i32, i32) {
    %c0_i32 = arith.constant 0 : i32
    %c0_i32_0 = arith.constant 0 : i32
    return %arg0, %c0_i32 : i32, i32
  }
  func.func @transform_2(%arg0: i32) -> (i32, i32) {
    %c0_i32 = arith.constant 0 : i32
    %c0_i32_0 = arith.constant 0 : i32
    return %arg0, %c0_i32 : i32, i32
  }
  func.func @transform_3(%arg0: i32) -> (i32, i32) {
    %c0_i32 = arith.constant 0 : i32
    %c0_i32_0 = arith.constant 0 : i32
    return %arg0, %c0_i32 : i32, i32
  }
  func.func @transform_4(%arg0: i32) -> (i32, i32) {
    %c0_i32 = arith.constant 0 : i32
    %c0_i32_0 = arith.constant 0 : i32
    return %arg0, %c0_i32 : i32, i32
  }
  func.func @transform_5(%arg0: i32) -> (i32, i32) {
    %c0_i32 = arith.constant 0 : i32
    %c0_i32_0 = arith.constant 0 : i32
    %c0_i32_1 = arith.constant 0 : i32
    return %c0_i32, %c0_i32_0 : i32, i32
  }
  func.func @transform_6(%arg0: i32) -> (i32, i32) {
    %c0_i32 = arith.constant 0 : i32
    %c0_i32_0 = arith.constant 0 : i32
    %c0_i32_1 = arith.constant 0 : i32
    return %c0_i32, %c0_i32_0 : i32, i32
  }
  func.func @transform_7(%arg0: i32) -> (i32, i32) {
    %c0_i32 = arith.constant 0 : i32
    %c0_i32_0 = arith.constant 0 : i32
    %c0_i32_1 = arith.constant 0 : i32
    return %c0_i32, %c0_i32_0 : i32, i32
  }
  func.func @transform_8(%arg0: i32) -> (i32, i32) {
    %c0_i32 = arith.constant 0 : i32
    %c0_i32_0 = arith.constant 0 : i32
    %c0_i32_1 = arith.constant 0 : i32
    return %c0_i32, %c0_i32_0 : i32, i32
  }
  func.func @transform_9(%arg0: i32) -> (i32, i32) {
    %c0_i32 = arith.constant 0 : i32
    %c0_i32_0 = arith.constant 0 : i32
    %c0_i32_1 = arith.constant 0 : i32
    return %c0_i32, %c0_i32_0 : i32, i32
  }
  func.func @transform_10(%arg0: i32) -> (i32, i32) {
    %c0_i32 = arith.constant 0 : i32
    %c0_i32_0 = arith.constant 0 : i32
    %c0_i32_1 = arith.constant 0 : i32
    return %c0_i32, %c0_i32_0 : i32, i32
  }
  func.func @transform_11(%arg0: i32) -> (i32, i32) {
    %c0_i32 = arith.constant 0 : i32
    %c0_i32_0 = arith.constant 0 : i32
    %c0_i32_1 = arith.constant 0 : i32
    return %c0_i32, %c0_i32_0 : i32, i32
  }
  func.func @transform_12(%arg0: i32) -> (i32, i32) {
    %c0_i32 = arith.constant 0 : i32
    %c0_i32_0 = arith.constant 0 : i32
    %c0_i32_1 = arith.constant 0 : i32
    return %c0_i32, %c0_i32_0 : i32, i32
  }
  func.func @transform_13(%arg0: i32) -> (i32, i32) {
    %c0_i32 = arith.constant 0 : i32
    %c0_i32_0 = arith.constant 0 : i32
    %c0_i32_1 = arith.constant 0 : i32
    return %c0_i32, %c0_i32_0 : i32, i32
  }
  func.func @transform_14(%arg0: i32) -> (i32, i32) {
    %c0_i32 = arith.constant 0 : i32
    %c0_i32_0 = arith.constant 0 : i32
    %c0_i32_1 = arith.constant 0 : i32
    return %c0_i32, %c0_i32_0 : i32, i32
  }
  func.func @transform_15(%arg0: i32) -> (i32, i32) {
    %c0_i32 = arith.constant 0 : i32
    %c0_i32_0 = arith.constant 0 : i32
    %c0_i32_1 = arith.constant 0 : i32
    return %c0_i32, %c0_i32_0 : i32, i32
  }
  func.func @transform_16(%arg0: i32) -> (i32, i32) {
    %c0_i32 = arith.constant 0 : i32
    %c0_i32_0 = arith.constant 0 : i32
    %c0_i32_1 = arith.constant 0 : i32
    return %c0_i32, %c0_i32_0 : i32, i32
  }
  func.func @transform_17(%arg0: i32) -> (i32, i32) {
    %c0_i32 = arith.constant 0 : i32
    %c0_i32_0 = arith.constant 0 : i32
    return %arg0, %c0_i32 : i32, i32
  }
}

</mosaic_0001>

<bundles_post_ra>
// kernel: tpu_custom_call.1
= control target key start
LH: loop header
LB: loop body
LE: loop exit
PB: predicated region body
PF: predicated region fallthrough
CT: control target
= control target key end

     0   :  { %s2199_s0 = inlined_call_operand.vmem [shape: f32[128,64], index: 0, kind: input, shape index: {}]   ;;  %s2200_s1 = inlined_call_operand.vmem [shape: f32[128,96], index: 1, kind: input, shape index: {}]   ;;  %s2201_s2 = inlined_call_operand.vmem [shape: f32[128,64], index: 2, kind: input, shape index: {}]   ;;  %s2202_s3 = inlined_call_operand.vmem [shape: f32[128,64], index: 3, kind: input, shape index: {}]   ;;  %s2203_s4 = inlined_call_operand.vmem [shape: f32[128,64], index: 4, kind: input, shape index: {}]   ;;  %s2204_s5 = inlined_call_operand.vmem [shape: f32[64,64], index: 5, kind: input, shape index: {}]   ;;  %s2205_s6 = inlined_call_operand.vmem [shape: f32[1,64], index: 6, kind: input, shape index: {}]   ;;  %s2206_s7 = inlined_call_operand.vmem [shape: f32[64,64], index: 7, kind: input, shape index: {}]   ;;  %s2207_s8 = inlined_call_operand.vmem [shape: f32[96,64], index: 8, kind: input, shape index: {}]   ;;  %s2208_s9 = inlined_call_operand.vmem [shape: f32[64,64], index: 9, kind: input, shape index: {}]   ;;  %s2209_s10 = inlined_call_operand.vmem [shape: f32[64,64], index: 10, kind: input, shape index: {}]   ;;  %s2210_s11 = inlined_call_operand.vmem [shape: f32[64,64], index: 11, kind: input, shape index: {}]   ;;  %s2211_s12 = inlined_call_operand.vmem [shape: f32[1,64], index: 12, kind: input, shape index: {}]   ;;  %s2212_s13 = inlined_call_operand.vmem [shape: f32[64,64], index: 13, kind: input, shape index: {}]   ;;  %s2213_s14 = inlined_call_operand.vmem [shape: f32[1,64], index: 14, kind: input, shape index: {}]   ;;  %s2214_s15 = inlined_call_operand.vmem [shape: f32[1,64], index: 15, kind: input, shape index: {}]   ;;  %s2215_s16 = inlined_call_operand.<no memory space> [shape: f32[1,1], index: 16, kind: input, shape index: {}]   ;;  %s2216_s17 = inlined_call_operand.hbm [shape: f32[1,128], index: 17, kind: output, shape index: {}]  }
   0x1   :  { %2219 = sst [smem:[#allocation6_spill]] %s2199_s0  ;;  %v22_v0 = vstv %s2215_s16 }
   0x2   :  { %2220 = sst [smem:[#allocation7_spill]] %s2200_s1  ;;  %23 = vst [vmem:[#allocation2] sm:$0x1] %v22_v0 }
   0x3   :  { %v106_v1 = vld [vmem:[%s2209_s10 + $0x38] sm:$0xff]  ;;  %v105_v4 = vld [vmem:[%s2209_s10 + $0x30] sm:$0xff]  ;;  %v104_v7 = vld [vmem:[%s2209_s10 + $0x28] sm:$0xff]  ;;  %vm107_vm0 = vcmask 523264  }
   0x4   :  { %v82_v2 = vld [vmem:[%s2208_s9 + $0x38] sm:$0xff]  ;;  %164 = vmatpush.msra.mxu0 %v106_v1  ;;  %v81_v5 = vld [vmem:[%s2208_s9 + $0x30] sm:$0xff]  ;;  %v80_v8 = vld [vmem:[%s2208_s9 + $0x28] sm:$0xff]  ;;  %1341 = vmatpush.msra.mxu3 %v106_v1 }
   0x5   :  { %v1501_v3 = vld [vmem:[%s2210_s11 + $0x38] sm:$0xff]  ;;  %277 = vmatpush.msra.mxu1 %v82_v2  ;;  %v1512_v6 = vld [vmem:[%s2210_s11 + $0x30] sm:$0xff]  ;;  %v1524_v9 = vld [vmem:[%s2210_s11 + $0x28] sm:$0xff] }
   0x6   :  { %414 = vmatpush.msra.mxu2 %v1501_v3  ;;  %165 = vmatpush.msra.mxu0 %v105_v4  ;;  %v103_v10 = vld [vmem:[%s2209_s10 + $0x20] sm:$0xff]  ;;  %v102_v13 = vld [vmem:[%s2209_s10 + $0x18] sm:$0xff]  ;;  %v101_v16 = vld [vmem:[%s2209_s10 + $0x10] sm:$0xff] }
   0x7   :  { %278 = vmatpush.msra.mxu1 %v81_v5  ;;  %v79_v11 = vld [vmem:[%s2208_s9 + $0x20] sm:$0xff]  ;;  %1342 = vmatpush.msra.mxu3 %v105_v4  ;;  %v78_v14 = vld [vmem:[%s2208_s9 + $0x18] sm:$0xff]  ;;  %v77_v17 = vld [vmem:[%s2208_s9 + $0x10] sm:$0xff] }
   0x8   :  { %415 = vmatpush.msra.mxu2 %v1512_v6  ;;  %166 = vmatpush.msra.mxu0 %v104_v7  ;;  %v1536_v12 = vld [vmem:[%s2210_s11 + $0x20] sm:$0xff]  ;;  %v1548_v15 = vld [vmem:[%s2210_s11 + $0x18] sm:$0xff]  ;;  %v1560_v18 = vld [vmem:[%s2210_s11 + $0x10] sm:$0xff] }
   0x9   :  { %279 = vmatpush.msra.mxu1 %v80_v8  ;;  %1343 = vmatpush.msra.mxu3 %v104_v7  ;;  %v100_v19 = vld [vmem:[%s2209_s10 + $0x8] sm:$0xff]  ;;  %v99_v22 = vld [vmem:[%s2209_s10] sm:$0xff] }
   0xa   :  { %416 = vmatpush.msra.mxu2 %v1524_v9  ;;  %167 = vmatpush.msra.mxu0 %v103_v10  ;;  %v76_v20 = vld [vmem:[%s2208_s9 + $0x8] sm:$0xff]  ;;  %v75_v23 = vld [vmem:[%s2208_s9] sm:$0xff] }
   0xb   :  { %280 = vmatpush.msra.mxu1 %v79_v11  ;;  %1344 = vmatpush.msra.mxu3 %v103_v10  ;;  %v1572_v21 = vld [vmem:[%s2210_s11 + $0x8] sm:$0xff]  ;;  %v1584_v24 = vld [vmem:[%s2210_s11] sm:$0xff] }
   0xc   :  { %417 = vmatpush.msra.mxu2 %v1536_v12  ;;  %168 = vmatpush.msra.mxu0 %v102_v13  ;;  %v83_v25 = vld [vmem:[%s2202_s3] sm:$0xff] }
   0xd   :  { %281 = vmatpush.msra.mxu1 %v78_v14  ;;  %1345 = vmatpush.msra.mxu3 %v102_v13 }
   0xe   :  { %418 = vmatpush.msra.mxu2 %v1548_v15  ;;  %169 = vmatpush.msra.mxu0 %v101_v16 }
   0xf   :  { %282 = vmatpush.msra.mxu1 %v77_v17  ;;  %1346 = vmatpush.msra.mxu3 %v101_v16 }
  0x10   :  { %419 = vmatpush.msra.mxu2 %v1560_v18  ;;  %170 = vmatpush.msra.mxu0 %v100_v19 }
  0x11   :  { %283 = vmatpush.msra.mxu1 %v76_v20 }
  0x12   :  { %24 = vsyncpa [#allocation4], 0  ;;  %420 = vmatpush.msra.mxu2 %v1572_v21  ;;  %v59_v26 = vld [vmem:[%s2201_s2] sm:$0xff]  ;;  %1347 = vmatpush.msra.mxu3 %v100_v19  ;;  %v84_v28 = vld [vmem:[%s2202_s3 + $0x8] sm:$0xff]  ;;  %s2221_s11 = sld [smem:[#allocation6_spill]]  ;;  %vm837_vm1 = vcmask 785408  }
  0x13   :  { %v334_v27 = vld [vmem:[%s2203_s4] sm:$0xff]  ;;  %171 = vmatpush.msra.mxu0 %v99_v22  ;;  %284 = vmatpush.msra.mxu1 %v75_v23  ;;  %v60_v29 = vld [vmem:[%s2201_s2 + $0x8] sm:$0xff]  ;;  %v85_v31 = vld [vmem:[%s2202_s3 + $0x10] sm:$0xff]  ;;  %s2222_s18 = sld [smem:[#allocation7_spill]] }
  0x14   :  { %421 = vmatpush.msra.mxu2 %v1584_v24  ;;  %1212 = vmatmul.msk.f32.vlgmr.msra.gmra.mxu0 %vm107_vm0, %v83_v25  ;;  %v335_v30 = vld [vmem:[%s2203_s4 + $0x8] sm:$0xff]  ;;  %v61_v32 = vld [vmem:[%s2201_s2 + $0x10] sm:$0xff]  ;;  %v86_v34 = vld [vmem:[%s2202_s3 + $0x18] sm:$0xff] }
  0x15   :  { %1228 = vmatmul.msk.f32.vlgmr.msra.gmra.mxu1 %vm107_vm0, %v59_v26  ;;  %1244 = vmatmul.msk.f32.vlgmr.msra.gmra.mxu2 %vm107_vm0, %v334_v27  ;;  %v336_v33 = vld [vmem:[%s2203_s4 + $0x10] sm:$0xff]  ;;  %v62_v35 = vld [vmem:[%s2201_s2 + $0x18] sm:$0xff]  ;;  %v87_v37 = vld [vmem:[%s2202_s3 + $0x20] sm:$0xff] }
  0x16   :  { %1348 = vmatpush.msra.mxu3 %v99_v22  ;;  %v337_v36 = vld [vmem:[%s2203_s4 + $0x18] sm:$0xff]  ;;  %v63_v38 = vld [vmem:[%s2201_s2 + $0x20] sm:$0xff]  ;;  %v96_v41 = vld [vmem:[%s2202_s3 + $0x68] sm:$0xff] }
  0x17   :  { %v338_v39 = vld [vmem:[%s2203_s4 + $0x20] sm:$0xff]  ;;  %v667_v40 = vld [vmem:[%s2204_s5 + $0x38] sm:$0xff]  ;;  %1225 = vmatmul.msk.f32.vlgmr.msra.gmra.mxu3 %vm107_vm0, %v96_v41  ;;  %v88_v42 = vld [vmem:[%s2202_s3 + $0x28] sm:$0xff] }
  0x18   :  { %1349 = vmatpush.msrb.mxu3 %v82_v2  ;;  %728 = vmatpush.msrb.mxu0 %v667_v40  ;;  %v64_v43 = vld [vmem:[%s2201_s2 + $0x28] sm:$0xff]  ;;  %v97_v45 = vld [vmem:[%s2202_s3 + $0x70] sm:$0xff]  ;;  %v98_v50 = vld [vmem:[%s2202_s3 + $0x78] sm:$0xff] }
  0x19   :  { %v339_v44 = vld [vmem:[%s2203_s4 + $0x28] sm:$0xff]  ;;  %v666_v46 = vld [vmem:[%s2204_s5 + $0x30] sm:$0xff]  ;;  %v90_v51 = vld [vmem:[%s2202_s3 + $0x38] sm:$0xff] }
  0x1a   :  { %1350 = vmatpush.msrb.mxu3 %v81_v5  ;;  %729 = vmatpush.msrb.mxu0 %v666_v46  ;;  %v89_v47 = vld [vmem:[%s2202_s3 + $0x30] sm:$0xff]  ;;  %v66_v52 = vld [vmem:[%s2201_s2 + $0x38] sm:$0xff]  ;;  %v72_v54 = vld [vmem:[%s2201_s2 + $0x68] sm:$0xff] }
  0x1b   :  { %v65_v48 = vld [vmem:[%s2201_s2 + $0x30] sm:$0xff]  ;;  %v341_v53 = vld [vmem:[%s2203_s4 + $0x38] sm:$0xff]  ;;  %v665_v55 = vld [vmem:[%s2204_s5 + $0x28] sm:$0xff] }
  0x1c   :  { %1351 = vmatpush.msrb.mxu3 %v80_v8  ;;  %1213 = vmatmul.msk.f32.gmra.mxu0 %vm107_vm0, %v84_v28  ;;  %v340_v49 = vld [vmem:[%s2203_s4 + $0x30] sm:$0xff]  ;;  %v664_v56 = vld [vmem:[%s2204_s5 + $0x20] sm:$0xff]  ;;  %v663_v60 = vld [vmem:[%s2204_s5 + $0x18] sm:$0xff] }
  0x1d   :  { %1229 = vmatmul.msk.f32.gmra.mxu1 %vm107_vm0, %v60_v29  ;;  %1245 = vmatmul.msk.f32.gmra.mxu2 %vm107_vm0, %v335_v30  ;;  %v91_v57 = vld [vmem:[%s2202_s3 + $0x40] sm:$0xff]  ;;  %v73_v61 = vld [vmem:[%s2201_s2 + $0x70] sm:$0xff]  ;;  %v661_v63 = vld [vmem:[%s2204_s5 + $0x8] sm:$0xff] }
  0x1e   :  { %1352 = vmatpush.msrb.mxu3 %v79_v11  ;;  %730 = vmatpush.msrb.mxu0 %v665_v55  ;;  %v67_v58 = vld [vmem:[%s2201_s2 + $0x40] sm:$0xff]  ;;  %v662_v62 = vld [vmem:[%s2204_s5 + $0x10] sm:$0xff]  ;;  %v92_v0 = vld [vmem:[%s2202_s3 + $0x48] sm:$0xff] }
  0x1f   :  { %1226 = vmatmul.msk.f32.gmra.mxu3 %vm107_vm0, %v97_v45  ;;  %v342_v59 = vld [vmem:[%s2203_s4 + $0x40] sm:$0xff]  ;;  %v68_v1 = vld [vmem:[%s2201_s2 + $0x48] sm:$0xff]  ;;  %v74_v4 = vld [vmem:[%s2201_s2 + $0x78] sm:$0xff] }
  0x20   :  { %1353 = vmatpush.msrb.mxu3 %v78_v14  ;;  %731 = vmatpush.msrb.mxu0 %v664_v56  ;;  %v343_v2 = vld [vmem:[%s2203_s4 + $0x48] sm:$0xff]  ;;  %v93_v5 = vld [vmem:[%s2202_s3 + $0x50] sm:$0xff]  ;;  %v70_v10 = vld [vmem:[%s2201_s2 + $0x58] sm:$0xff] }
  0x21   :  { %v344_v7 = vld [vmem:[%s2203_s4 + $0x50] sm:$0xff]  ;;  %v347_v8 = vld [vmem:[%s2203_s4 + $0x68] sm:$0xff]  ;;  %v345_v11 = vld [vmem:[%s2203_s4 + $0x58] sm:$0xff] }
  0x22   :  { %1354 = vmatpush.msrb.mxu3 %v77_v17  ;;  %732 = vmatpush.msrb.mxu0 %v663_v60  ;;  %v530_v13 = vld [vmem:[%s2212_s13 + $0x38] sm:$0xff]  ;;  %v95_v14 = vld [vmem:[%s2202_s3 + $0x60] sm:$0xff]  ;;  %v645_v26 = vld [vmem:[%s2221_s11 + $0x8] sm:$0xff] }
  0x23   :  { %v71_v16 = vld [vmem:[%s2201_s2 + $0x60] sm:$0xff]  ;;  %v646_v27 = vld [vmem:[%s2221_s11 + $0x10] sm:$0xff]  ;;  %v647_v29 = vld [vmem:[%s2221_s11 + $0x18] sm:$0xff] }
  0x24   :  { %1214 = vmatmul.msk.f32.gmra.mxu0 %vm107_vm0, %v85_v31  ;;  %1355 = vmatpush.msrb.mxu3 %v76_v20  ;;  %v346_v17 = vld [vmem:[%s2203_s4 + $0x60] sm:$0xff]  ;;  %v349_v20 = vld [vmem:[%s2203_s4 + $0x78] sm:$0xff] }
  0x25   :  { %1230 = vmatmul.msk.f32.gmra.mxu1 %vm107_vm0, %v61_v32  ;;  %1246 = vmatmul.msk.f32.gmra.mxu2 %vm107_vm0, %v336_v33  ;;  %v527_v19 = vld [vmem:[%s2212_s13 + $0x20] sm:$0xff]  ;;  %v651_v60 = vld [vmem:[%s2221_s11 + $0x38] sm:$0xff] }
  0x26   :  { %1356 = vmatpush.msrb.mxu3 %v75_v23  ;;  %733 = vmatpush.msrb.mxu0 %v662_v62  ;;  %v644_v22 = vld [vmem:[%s2221_s11] sm:$0xff]  ;;  %v525_v23 = vld [vmem:[%s2212_s13 + $0x10] sm:$0xff] }
  0x27   :  { %1227 = vmatmul.msk.f32.gmra.mxu3 %vm107_vm0, %v98_v50  ;;  %v523_v25 = vld [vmem:[%s2212_s13] sm:$0xff] }
  0x28   :  { %1357 = vmatpush.msra.mxu3 %v1501_v3  ;;  %734 = vmatpush.msrb.mxu0 %v661_v63  ;;  %v660_v3 = vld [vmem:[%s2204_s5] sm:$0xff] }
  0x29   :  { %v1855_v32 = vld [vmem:[%s2211_s12] ss:$0 sm:$0xff]  ;;  %s1203_s12 = sshll.u32 %s2216_s17, 4  ;;  %s1204_s12 = int_to_ptr.hbm [resolvable:$true] %s1203_s12 }
  0x2a   :  { %1358 = vmatpush.msra.mxu3 %v1512_v6  ;;  %735 = vmatpush.msrb.mxu0 %v660_v3  ;;  %v69_v6 = vld [vmem:[%s2201_s2 + $0x50] sm:$0xff] }
  0x2c   :  { %1215 = vmatmul.msk.f32.gmra.mxu0 %vm107_vm0, %v86_v34  ;;  %1359 = vmatpush.msra.mxu3 %v1524_v9  ;;  %v94_v9 = vld [vmem:[%s2202_s3 + $0x58] sm:$0xff] }
  0x2d   :  { %1231 = vmatmul.msk.f32.gmra.mxu1 %vm107_vm0, %v62_v35  ;;  %1247 = vmatmul.msk.f32.gmra.mxu2 %vm107_vm0, %v337_v36  ;;  %v648_v36 = vld [vmem:[%s2221_s11 + $0x20] sm:$0xff] }
  0x2e   :  { %1360 = vmatpush.msra.mxu3 %v1536_v12  ;;  %v348_v12 = vld [vmem:[%s2203_s4 + $0x70] sm:$0xff] }
  0x2f   :  { %1241 = vmatmul.msk.f32.vlgmr.msrb.gmra.mxu3 %vm107_vm0, %v72_v54 }
  0x30   :  { %1361 = vmatpush.msra.mxu3 %v1548_v15  ;;  %v529_v15 = vld [vmem:[%s2212_s13 + $0x30] sm:$0xff] }
  0x32   :  { %1362 = vmatpush.msra.mxu3 %v1560_v18  ;;  %v528_v18 = vld [vmem:[%s2212_s13 + $0x28] sm:$0xff] }
  0x34   :  { %1216 = vmatmul.msk.f32.gmra.mxu0 %vm107_vm0, %v87_v37  ;;  %1363 = vmatpush.msra.mxu3 %v1572_v21  ;;  %v526_v21 = vld [vmem:[%s2212_s13 + $0x18] sm:$0xff] }
  0x35   :  { %1232 = vmatmul.msk.f32.gmra.mxu1 %vm107_vm0, %v63_v38  ;;  %1248 = vmatmul.msk.f32.gmra.mxu2 %vm107_vm0, %v338_v39 }
  0x36   :  { %1364 = vmatpush.msra.mxu3 %v1584_v24  ;;  %v524_v24 = vld [vmem:[%s2212_s13 + $0x8] sm:$0xff] }
  0x37   :  { %1242 = vmatmul.msk.f32.gmra.mxu3 %vm107_vm0, %v73_v61 }
  0x38   :  { %587 = vmatpush.msrb.mxu3 %v530_v13 }
  0x3a   :  { %588 = vmatpush.msrb.mxu3 %v529_v15  ;;  %v653_v15 = vld [vmem:[%s2221_s11 + $0x48] sm:$0xff] }
  0x3c   :  { %1217 = vmatmul.msk.f32.gmra.mxu0 %vm107_vm0, %v88_v42  ;;  %589 = vmatpush.msrb.mxu3 %v528_v18 }
  0x3d   :  { %1233 = vmatmul.msk.f32.gmra.mxu1 %vm107_vm0, %v64_v43  ;;  %1249 = vmatmul.msk.f32.gmra.mxu2 %vm107_vm0, %v339_v44  ;;  %v649_v44 = vld [vmem:[%s2221_s11 + $0x28] sm:$0xff] }
  0x3e   :  { %590 = vmatpush.msrb.mxu3 %v527_v19 }
  0x3f   :  { %1243 = vmatmul.msk.f32.gmra.mxu3 %vm107_vm0, %v74_v4  ;;  %v652_v4 = vld [vmem:[%s2221_s11 + $0x40] sm:$0xff] }
  0x40   :  { %591 = vmatpush.msrb.mxu3 %v526_v21 }
  0x42   :  { %592 = vmatpush.msrb.mxu3 %v525_v23 }
  0x44   :  { %1218 = vmatmul.msk.f32.gmra.mxu0 %vm107_vm0, %v89_v47  ;;  %593 = vmatpush.msrb.mxu3 %v524_v24 }
  0x45   :  { %1234 = vmatmul.msk.f32.gmra.mxu1 %vm107_vm0, %v65_v48  ;;  %1250 = vmatmul.msk.f32.gmra.mxu2 %vm107_vm0, %v340_v49 }
  0x46   :  { %594 = vmatpush.msrb.mxu3 %v523_v25 }
  0x47   :  { %1257 = vmatmul.msk.f32.vlgmr.msra.gmra.mxu3 %vm107_vm0, %v347_v8 }
  0x4c   :  { %1219 = vmatmul.msk.f32.gmra.mxu0 %vm107_vm0, %v90_v51 }
  0x4d   :  { %1235 = vmatmul.msk.f32.gmra.mxu1 %vm107_vm0, %v66_v52  ;;  %1251 = vmatmul.msk.f32.gmra.mxu2 %vm107_vm0, %v341_v53  ;;  %v650_v52 = vld [vmem:[%s2221_s11 + $0x30] sm:$0xff] }
  0x4f   :  { %1258 = vmatmul.msk.f32.gmra.mxu3 %vm107_vm0, %v348_v12 }
  0x54   :  { %1220 = vmatmul.msk.f32.gmra.mxu0 %vm107_vm0, %v91_v57 }
  0x55   :  { %1236 = vmatmul.msk.f32.gmra.mxu1 %vm107_vm0, %v67_v58  ;;  %1252 = vmatmul.msk.f32.gmra.mxu2 %vm107_vm0, %v342_v59 }
  0x57   :  { %1259 = vmatmul.msk.f32.gmra.mxu3 %vm107_vm0, %v349_v20  ;;  %v807_v20 = vld [vmem:[%s2206_s7 + $0x30] sm:$0xff] }
  0x5c   :  { %1221 = vmatmul.msk.f32.gmra.mxu0 %vm107_vm0, %v92_v0 }
  0x5d   :  { %1237 = vmatmul.msk.f32.gmra.mxu1 %vm107_vm0, %v68_v1  ;;  %1253 = vmatmul.msk.f32.gmra.mxu2 %vm107_vm0, %v343_v2 }
  0x64   :  { %1222 = vmatmul.msk.f32.gmra.mxu0 %vm107_vm0, %v93_v5 }
  0x65   :  { %1238 = vmatmul.msk.f32.gmra.mxu1 %vm107_vm0, %v69_v6  ;;  %1254 = vmatmul.msk.f32.gmra.mxu2 %vm107_vm0, %v344_v7 }
  0x6c   :  { %1223 = vmatmul.msk.f32.gmra.mxu0 %vm107_vm0, %v94_v9  ;;  %v808_v9 = vld [vmem:[%s2206_s7 + $0x38] sm:$0xff] }
  0x6d   :  { %1239 = vmatmul.msk.f32.gmra.mxu1 %vm107_vm0, %v70_v10  ;;  %1255 = vmatmul.msk.f32.gmra.mxu2 %vm107_vm0, %v345_v11  ;;  %v836_v10 = vld [vmem:[%s2207_s8 + $0x58] sm:$0xff] }
  0x6e   :  { %1007 = vmatpush.msrb.mxu2 %v808_v9  ;;  %890 = vmatpush.msrb.mxu1 %v836_v10  ;;  %v825_v9 = vld [vmem:[%s2207_s8] sm:$0xff] }
  0x6f   :  { %v809_v10 = vld [vmem:[%s2222_s18] sm:$0xff] }
  0x70   :  { %1008 = vmatpush.msrb.mxu2 %v807_v20 }
  0x74   :  { %1224 = vmatmul.msk.f32.gmra.mxu0 %vm107_vm0, %v95_v14 }
  0x75   :  { %1240 = vmatmul.msk.f32.gmra.mxu1 %vm107_vm0, %v71_v16  ;;  %1256 = vmatmul.msk.f32.gmra.mxu2 %vm107_vm0, %v346_v17 }
  0x7c   :  { %1276 = vmatmul.msk.f32.vlgmr.msrb.gmra.mxu0 %vm107_vm0, %v644_v22  ;;  %v835_v22 = vld [vmem:[%s2207_s8 + $0x50] sm:$0xff] }
  0x7d   :  { %891 = vmatpush.msrb.mxu1 %v835_v22 }
  0x84   :  { %1277 = vmatmul.msk.f32.gmra.mxu0 %vm107_vm0, %v645_v26  ;;  %v654_v26 = vld [vmem:[%s2221_s11 + $0x50] sm:$0xff] }
  0x8c   :  { %1278 = vmatmul.msk.f32.gmra.mxu0 %vm107_vm0, %v646_v27 }
  0x91   :  { %v173_v28 = vpop.f32.mrf.mxu0 }
  0x92   :  { %v286_v30 = vpop.f32.mrf.mxu1 }
  0x93   :  { %v287_v31 = vadd.f32 %v286_v30, %v173_v28 }
  0x94   :  { %1279 = vmatmul.msk.f32.gmra.mxu0 %vm107_vm0, %v647_v29 }
  0x98   :  { %v423_v33 = vpop.f32.mrf.mxu2 }
  0x99   :  { %v471_v34 = vadd.f32 %v423_v33, %v287_v31  ;;  %v176_v35 = vpop.f32.mrf.mxu0 }
  0x9a   :  { %v289_v37 = vpop.f32.mrf.mxu1  ;;  %v1884_v6 = vpop.f32.mrf.mxu3 }
  0x9b   :  { %v491_v38 = vadd.f32 %v1855_v32, %v471_v34  ;;  %v290_v40 = vadd.f32 %v289_v37, %v176_v35  ;;  %v834_v37 = vld [vmem:[%s2207_s8 + $0x48] sm:$0xff] }
  0x9c   :  { %1280 = vmatmul.msk.f32.gmra.mxu0 %vm107_vm0, %v648_v36  ;;  %v655_v36 = vld [vmem:[%s2221_s11 + $0x58] sm:$0xff]  ;;  %892 = vmatpush.msrb.mxu1 %v834_v37 }
  0x9d   :  { %v507_v39 = vmax.f32 %v491_v38, 0.0 }
  0x9f   :  { %1260 = vmatmul.msk.f32.vlgmr.msrb.gmra.mxu3 %vm107_vm0, %v507_v39 }
  0xa0   :  { %v426_v41 = vpop.f32.mrf.mxu2 }
  0xa1   :  { %v472_v42 = vadd.f32 %v426_v41, %v290_v40  ;;  %v179_v43 = vpop.f32.mrf.mxu0  ;;  %v806_v40 = vld [vmem:[%s2206_s7 + $0x28] sm:$0xff]  ;;  %v833_v41 = vld [vmem:[%s2207_s8 + $0x40] sm:$0xff] }
  0xa2   :  { %v292_v45 = vpop.f32.mrf.mxu1  ;;  %v1900_v18 = vpop.f32.mrf.mxu3  ;;  %1009 = vmatpush.msrb.mxu2 %v806_v40  ;;  %893 = vmatpush.msrb.mxu1 %v833_v41 }
  0xa3   :  { %v492_v46 = vadd.f32 %v1855_v32, %v472_v42  ;;  %v293_v48 = vadd.f32 %v292_v45, %v179_v43  ;;  %v832_v43 = vld [vmem:[%s2207_s8 + $0x38] sm:$0xff] }
  0xa4   :  { %1281 = vmatmul.msk.f32.gmra.mxu0 %vm107_vm0, %v649_v44  ;;  %v805_v44 = vld [vmem:[%s2206_s7 + $0x20] sm:$0xff]  ;;  %894 = vmatpush.msrb.mxu1 %v832_v43 }
  0xa5   :  { %v508_v47 = vmax.f32 %v492_v46, 0.0  ;;  %1010 = vmatpush.msrb.mxu2 %v805_v44  ;;  %v831_v46 = vld [vmem:[%s2207_s8 + $0x30] sm:$0xff] }
  0xa6   :  { %895 = vmatpush.msrb.mxu1 %v831_v46 }
  0xa7   :  { %1261 = vmatmul.msk.f32.gmra.mxu3 %vm107_vm0, %v508_v47  ;;  %v804_v47 = vld [vmem:[%s2206_s7 + $0x18] sm:$0xff] }
  0xa8   :  { %v429_v49 = vpop.f32.mrf.mxu2  ;;  %1011 = vmatpush.msrb.mxu2 %v804_v47 }
  0xa9   :  { %v473_v50 = vadd.f32 %v429_v49, %v293_v48  ;;  %v182_v51 = vpop.f32.mrf.mxu0 }
  0xaa   :  { %v295_v53 = vpop.f32.mrf.mxu1  ;;  %v1914_v30 = vpop.f32.mrf.mxu3 }
  0xab   :  { %v493_v54 = vadd.f32 %v1855_v32, %v473_v50  ;;  %v296_v56 = vadd.f32 %v295_v53, %v182_v51  ;;  %v830_v53 = vld [vmem:[%s2207_s8 + $0x28] sm:$0xff] }
  0xac   :  { %1282 = vmatmul.msk.f32.gmra.mxu0 %vm107_vm0, %v650_v52  ;;  %v656_v52 = vld [vmem:[%s2221_s11 + $0x60] sm:$0xff]  ;;  %896 = vmatpush.msrb.mxu1 %v830_v53 }
  0xad   :  { %v509_v55 = vmax.f32 %v493_v54, 0.0  ;;  %v803_v54 = vld [vmem:[%s2206_s7 + $0x10] sm:$0xff] }
  0xae   :  { %1012 = vmatpush.msrb.mxu2 %v803_v54  ;;  %v813_v54 = vld [vmem:[%s2222_s18 + $0x20] sm:$0xff] }
  0xaf   :  { %1262 = vmatmul.msk.f32.gmra.mxu3 %vm107_vm0, %v509_v55 }
  0xb0   :  { %v432_v57 = vpop.f32.mrf.mxu2 }
  0xb1   :  { %v474_v58 = vadd.f32 %v432_v57, %v296_v56  ;;  %v185_v59 = vpop.f32.mrf.mxu0  ;;  %v829_v57 = vld [vmem:[%s2207_s8 + $0x20] sm:$0xff] }
  0xb2   :  { %v298_v61 = vpop.f32.mrf.mxu1  ;;  %v1944_v49 = vpop.f32.mrf.mxu3  ;;  %897 = vmatpush.msrb.mxu1 %v829_v57 }
  0xb3   :  { %v494_v62 = vadd.f32 %v1855_v32, %v474_v58  ;;  %v299_v0 = vadd.f32 %v298_v61, %v185_v59  ;;  %v802_v58 = vld [vmem:[%s2206_s7 + $0x8] sm:$0xff]  ;;  %v801_v61 = vld [vmem:[%s2206_s7] sm:$0xff]  ;;  %v326_v37 = vadd.f32 %v1944_v49, %v1884_v6 }
  0xb4   :  { %1283 = vmatmul.msk.f32.gmra.mxu0 %vm107_vm0, %v651_v60  ;;  %1013 = vmatpush.msrb.mxu2 %v802_v58  ;;  %v828_v60 = vld [vmem:[%s2207_s8 + $0x18] sm:$0xff] }
  0xb5   :  { %v510_v63 = vmax.f32 %v494_v62, 0.0  ;;  %898 = vmatpush.msrb.mxu1 %v828_v60 }
  0xb6   :  { %1014 = vmatpush.msrb.mxu2 %v801_v61 }
  0xb7   :  { %1263 = vmatmul.msk.f32.gmra.mxu3 %vm107_vm0, %v510_v63  ;;  %v827_v63 = vld [vmem:[%s2207_s8 + $0x10] sm:$0xff] }
  0xb8   :  { %v435_v1 = vpop.f32.mrf.mxu2  ;;  %899 = vmatpush.msrb.mxu1 %v827_v63 }
  0xb9   :  { %v475_v2 = vadd.f32 %v435_v1, %v299_v0  ;;  %v188_v3 = vpop.f32.mrf.mxu0 }
  0xba   :  { %v301_v5 = vpop.f32.mrf.mxu1 }
  0xbb   :  { %v495_v7 = vadd.f32 %v1855_v32, %v475_v2  ;;  %v302_v11 = vadd.f32 %v301_v5, %v188_v3  ;;  %v657_v3 = vld [vmem:[%s2221_s11 + $0x68] sm:$0xff] }
  0xbc   :  { %1284 = vmatmul.msk.f32.gmra.mxu0 %vm107_vm0, %v652_v4  ;;  %v826_v4 = vld [vmem:[%s2207_s8 + $0x8] sm:$0xff] }
  0xbd   :  { %v511_v8 = vmax.f32 %v495_v7, 0.0  ;;  %v328_v7 = vpop.f32.mrf.mxu3  ;;  %900 = vmatpush.msrb.mxu1 %v826_v4 }
  0xbe   :  { %v329_v6 = vadd.f32 %v328_v7, %v1900_v18  ;;  %v816_v7 = vld [vmem:[%s2222_s18 + $0x38] sm:$0xff] }
  0xbf   :  { %1264 = vmatmul.msk.f32.gmra.mxu3 %vm107_vm0, %v511_v8  ;;  %901 = vmatpush.msrb.mxu1 %v825_v9 }
  0xc0   :  { %v438_v12 = vpop.f32.mrf.mxu2  ;;  %1292 = vmatmul.msk.f32.vlgmr.msrb.gmra.mxu1 %vm837_vm1, %v809_v10 }
  0xc1   :  { %v476_v13 = vadd.f32 %v438_v12, %v302_v11  ;;  %v191_v14 = vpop.f32.mrf.mxu0 }
  0xc2   :  { %v304_v16 = vpop.f32.mrf.mxu1 }
  0xc3   :  { %v496_v17 = vadd.f32 %v1855_v32, %v476_v13  ;;  %v305_v21 = vadd.f32 %v304_v16, %v191_v14  ;;  %v658_v16 = vld [vmem:[%s2221_s11 + $0x70] sm:$0xff] }
  0xc4   :  { %1285 = vmatmul.msk.f32.gmra.mxu0 %vm107_vm0, %v653_v15 }
  0xc5   :  { %v512_v19 = vmax.f32 %v496_v17, 0.0  ;;  %v331_v20 = vpop.f32.mrf.mxu3 }
  0xc6   :  { %v332_v18 = vadd.f32 %v331_v20, %v1914_v30  ;;  %v819_v20 = vld [vmem:[%s2222_s18 + $0x50] sm:$0xff] }
  0xc7   :  { %1265 = vmatmul.msk.f32.gmra.mxu3 %vm107_vm0, %v512_v19 }
  0xc8   :  { %v441_v23 = vpop.f32.mrf.mxu2 }
  0xc9   :  { %v477_v24 = vadd.f32 %v441_v23, %v305_v21  ;;  %v194_v25 = vpop.f32.mrf.mxu0  ;;  %v810_v21 = vld [vmem:[%s2222_s18 + $0x8] sm:$0xff] }
  0xca   :  { %v307_v27 = vpop.f32.mrf.mxu1  ;;  %1293 = vmatmul.msk.f32.gmra.mxu1 %vm837_vm1, %v810_v21 }
  0xcb   :  { %v497_v28 = vadd.f32 %v1855_v32, %v477_v24  ;;  %v308_v31 = vadd.f32 %v307_v27, %v194_v25  ;;  %v659_v27 = vld [vmem:[%s2221_s11 + $0x78] sm:$0xff]  ;;  %s1398_s11 = smov [#allocation3]  }
  0xcc   :  { %1286 = vmatmul.msk.f32.gmra.mxu0 %vm107_vm0, %v654_v26  ;;  %s1201_s24 = sshll.u32 %s1398_s11, 4  ;;  %s1202_s24 = int_to_ptr.vmem [resolvable:$true] %s1201_s24 }
  0xcd   :  { %v513_v29 = vmax.f32 %v497_v28, 0.0 }
  0xcf   :  { %1266 = vmatmul.msk.f32.gmra.mxu3 %vm107_vm0, %v513_v29 }
  0xd0   :  { %v444_v33 = vpop.f32.mrf.mxu2 }
  0xd1   :  { %v478_v34 = vadd.f32 %v444_v33, %v308_v31  ;;  %v197_v35 = vpop.f32.mrf.mxu0  ;;  %v811_v31 = vld [vmem:[%s2222_s18 + $0x10] sm:$0xff] }
  0xd2   :  { %v310_v38 = vpop.f32.mrf.mxu1  ;;  %1294 = vmatmul.msk.f32.gmra.mxu1 %vm837_vm1, %v811_v31 }
  0xd3   :  { %v498_v39 = vadd.f32 %v1855_v32, %v478_v34  ;;  %v311_v45 = vadd.f32 %v310_v38, %v197_v35  ;;  %v2010_v34 = vld [vmem:[%s2205_s6] ss:$0 sm:$0xff]  ;;  %v462_v35 = vpop.f32.mrf.mxu3 }
  0xd4   :  { %1287 = vmatmul.msk.f32.gmra.mxu0 %vm107_vm0, %v655_v36  ;;  %v484_v43 = vadd.f32 %v462_v35, %v326_v37  ;;  %v822_v35 = vld [vmem:[%s2222_s18 + $0x68] sm:$0xff] }
  0xd5   :  { %v514_v42 = vmax.f32 %v498_v39, 0.0 }
  0xd6   :  { %v504_v47 = vadd.f32 %v1855_v32, %v484_v43 }
  0xd7   :  { %1267 = vmatmul.msk.f32.gmra.mxu3 %vm107_vm0, %v514_v42 }
  0xd8   :  { %v447_v48 = vpop.f32.mrf.mxu2 }
  0xd9   :  { %v479_v50 = vadd.f32 %v447_v48, %v311_v45  ;;  %v200_v51 = vpop.f32.mrf.mxu0  ;;  %v812_v45 = vld [vmem:[%s2222_s18 + $0x18] sm:$0xff] }
  0xda   :  { %v313_v55 = vpop.f32.mrf.mxu1  ;;  %1295 = vmatmul.msk.f32.gmra.mxu1 %vm837_vm1, %v812_v45 }
  0xdb   :  { %v499_v56 = vadd.f32 %v1855_v32, %v479_v50  ;;  %v314_v62 = vadd.f32 %v313_v55, %v200_v51  ;;  %v465_v48 = vpop.f32.mrf.mxu3  ;;  %v520_v51 = vmax.f32 %v504_v47, 0.0 }
  0xdc   :  { %1288 = vmatmul.msk.f32.gmra.mxu0 %vm107_vm0, %v656_v52  ;;  %v485_v52 = vadd.f32 %v465_v48, %v329_v6 }
  0xdd   :  { %v515_v59 = vmax.f32 %v499_v56, 0.0 }
  0xde   :  { %v505_v55 = vadd.f32 %v1855_v32, %v485_v52 }
  0xdf   :  { %1268 = vmatmul.msk.f32.gmra.mxu3 %vm107_vm0, %v515_v59 }
  0xe0   :  { %v450_v0 = vpop.f32.mrf.mxu2  ;;  %v521_v59 = vmax.f32 %v505_v55, 0.0 }
  0xe1   :  { %v480_v1 = vadd.f32 %v450_v0, %v314_v62  ;;  %v203_v2 = vpop.f32.mrf.mxu0  ;;  %v814_v62 = vld [vmem:[%s2222_s18 + $0x28] sm:$0xff] }
  0xe2   :  { %v316_v5 = vpop.f32.mrf.mxu1  ;;  %1296 = vmatmul.msk.f32.gmra.mxu1 %vm837_vm1, %v813_v54 }
  0xe3   :  { %v500_v8 = vadd.f32 %v1855_v32, %v480_v1  ;;  %v317_v12 = vadd.f32 %v316_v5, %v203_v2  ;;  %v468_v58 = vpop.f32.mrf.mxu3 }
  0xe4   :  { %1289 = vmatmul.msk.f32.gmra.mxu0 %vm107_vm0, %v657_v3  ;;  %v486_v60 = vadd.f32 %v468_v58, %v332_v18  ;;  %v815_v3 = vld [vmem:[%s2222_s18 + $0x30] sm:$0xff] }
  0xe5   :  { %v516_v11 = vmax.f32 %v500_v8, 0.0 }
  0xe6   :  { %v506_v30 = vadd.f32 %v1855_v32, %v486_v60 }
  0xe7   :  { %1269 = vmatmul.msk.f32.gmra.mxu3 %vm107_vm0, %v516_v11  ;;  %v817_v11 = vld [vmem:[%s2222_s18 + $0x40] sm:$0xff] }
  0xe8   :  { %v453_v13 = vpop.f32.mrf.mxu2  ;;  %v522_v1 = vmax.f32 %v506_v30, 0.0 }
  0xe9   :  { %v481_v14 = vadd.f32 %v453_v13, %v317_v12  ;;  %v206_v15 = vpop.f32.mrf.mxu0 }
  0xea   :  { %v319_v17 = vpop.f32.mrf.mxu1  ;;  %1297 = vmatmul.msk.f32.gmra.mxu1 %vm837_vm1, %v814_v62 }
  0xeb   :  { %v501_v19 = vadd.f32 %v1855_v32, %v481_v14  ;;  %v320_v23 = vadd.f32 %v319_v17, %v206_v15  ;;  %v818_v15 = vld [vmem:[%s2222_s18 + $0x48] sm:$0xff] }
  0xec   :  { %1290 = vmatmul.msk.f32.gmra.mxu0 %vm107_vm0, %v658_v16 }
  0xed   :  { %v517_v22 = vmax.f32 %v501_v19, 0.0 }
  0xef   :  { %1270 = vmatmul.msk.f32.gmra.mxu3 %vm107_vm0, %v517_v22 }
  0xf0   :  { %v456_v24 = vpop.f32.mrf.mxu2 }
  0xf1   :  { %v482_v25 = vadd.f32 %v456_v24, %v320_v23  ;;  %v209_v26 = vpop.f32.mrf.mxu0  ;;  %v820_v24 = vld [vmem:[%s2222_s18 + $0x58] sm:$0xff] }
  0xf2   :  { %v322_v29 = vpop.f32.mrf.mxu1  ;;  %1298 = vmatmul.msk.f32.gmra.mxu1 %vm837_vm1, %v815_v3 }
  0xf3   :  { %v502_v28 = vadd.f32 %v1855_v32, %v482_v25  ;;  %v323_v36 = vadd.f32 %v322_v29, %v209_v26 }
  0xf4   :  { %1291 = vmatmul.msk.f32.gmra.mxu0 %vm107_vm0, %v659_v27 }
  0xf5   :  { %v518_v33 = vmax.f32 %v502_v28, 0.0  ;;  %v821_v28 = vld [vmem:[%s2222_s18 + $0x60] sm:$0xff] }
  0xf7   :  { %1271 = vmatmul.msk.f32.gmra.mxu3 %vm107_vm0, %v518_v33 }
  0xf8   :  { %v459_v38 = vpop.f32.mrf.mxu2 }
  0xf9   :  { %v483_v39 = vadd.f32 %v459_v38, %v323_v36  ;;  %v737_v40 = vpop.f32.mrf.mxu0 }
  0xfa   :  { %v738_v41 = vadd.f32 %v2010_v34, %v737_v40  ;;  %1299 = vmatmul.msk.f32.gmra.mxu1 %vm837_vm1, %v816_v7 }
  0xfb   :  { %v503_v42 = vadd.f32 %v1855_v32, %v483_v39  ;;  %v823_v39 = vld [vmem:[%s2222_s18 + $0x70] sm:$0xff] }
  0xfc   :  { %v785_v44 = vmax.f32 %v738_v41, 0.0 }
  0xfd   :  { %v519_v46 = vmax.f32 %v503_v42, 0.0  ;;  %v824_v42 = vld [vmem:[%s2222_s18 + $0x78] sm:$0xff] }
  0xfe   :  { %1308 = vmatmul.msk.f32.vlgmr.msrb.gmra.mxu2 %vm107_vm0, %v785_v44 }
  0xff   :  { %1272 = vmatmul.msk.f32.gmra.mxu3 %vm107_vm0, %v519_v46 }
 0x101   :  { %v740_v49 = vpop.f32.mrf.mxu0 }
 0x102   :  { %v741_v50 = vadd.f32 %v2010_v34, %v740_v49  ;;  %1300 = vmatmul.msk.f32.gmra.mxu1 %vm837_vm1, %v817_v11 }
 0x104   :  { %v786_v53 = vmax.f32 %v741_v50, 0.0 }
 0x106   :  { %1309 = vmatmul.msk.f32.gmra.mxu2 %vm107_vm0, %v786_v53 }
 0x107   :  { %1273 = vmatmul.msk.f32.gmra.mxu3 %vm107_vm0, %v520_v51 }
 0x109   :  { %v743_v56 = vpop.f32.mrf.mxu0 }
 0x10a   :  { %v744_v57 = vadd.f32 %v2010_v34, %v743_v56  ;;  %1301 = vmatmul.msk.f32.gmra.mxu1 %vm837_vm1, %v818_v15 }
 0x10c   :  { %v787_v61 = vmax.f32 %v744_v57, 0.0 }
 0x10e   :  { %1310 = vmatmul.msk.f32.gmra.mxu2 %vm107_vm0, %v787_v61 }
 0x10f   :  { %1274 = vmatmul.msk.f32.gmra.mxu3 %vm107_vm0, %v521_v59 }
 0x111   :  { %v746_v63 = vpop.f32.mrf.mxu0 }
 0x112   :  { %v747_v0 = vadd.f32 %v2010_v34, %v746_v63  ;;  %1302 = vmatmul.msk.f32.gmra.mxu1 %vm837_vm1, %v819_v20 }
 0x114   :  { %v788_v2 = vmax.f32 %v747_v0, 0.0 }
 0x116   :  { %1311 = vmatmul.msk.f32.gmra.mxu2 %vm107_vm0, %v788_v2 }
 0x117   :  { %1275 = vmatmul.msk.f32.gmra.mxu3 %vm107_vm0, %v522_v1 }
 0x119   :  { %v749_v4 = vpop.f32.mrf.mxu0 }
 0x11a   :  { %v750_v32 = vadd.f32 %v2010_v34, %v749_v4  ;;  %1303 = vmatmul.msk.f32.gmra.mxu1 %vm837_vm1, %v820_v24 }
 0x11c   :  { %v789_v5 = vmax.f32 %v750_v32, 0.0 }
 0x11e   :  { %1312 = vmatmul.msk.f32.gmra.mxu2 %vm107_vm0, %v789_v5 }
 0x121   :  { %v752_v8 = vpop.f32.mrf.mxu0 }
 0x122   :  { %v753_v9 = vadd.f32 %v2010_v34, %v752_v8  ;;  %1304 = vmatmul.msk.f32.gmra.mxu1 %vm837_vm1, %v821_v28  ;;  %v2106_v47 = vpop.f32.mrf.mxu3 }
 0x124   :  { %v790_v10 = vmax.f32 %v753_v9, 0.0 }
 0x126   :  { %1313 = vmatmul.msk.f32.gmra.mxu2 %vm107_vm0, %v790_v10 }
 0x129   :  { %v755_v12 = vpop.f32.mrf.mxu0 }
 0x12a   :  { %v756_v13 = vadd.f32 %v2010_v34, %v755_v12  ;;  %1305 = vmatmul.msk.f32.gmra.mxu1 %vm837_vm1, %v822_v35  ;;  %v2110_v52 = vpop.f32.mrf.mxu3 }
 0x12c   :  { %v791_v14 = vmax.f32 %v756_v13, 0.0 }
 0x12e   :  { %1314 = vmatmul.msk.f32.gmra.mxu2 %vm107_vm0, %v791_v14 }
 0x131   :  { %v758_v16 = vpop.f32.mrf.mxu0 }
 0x132   :  { %v759_v17 = vadd.f32 %v2010_v34, %v758_v16  ;;  %1306 = vmatmul.msk.f32.gmra.mxu1 %vm837_vm1, %v823_v39  ;;  %v2114_v56 = vpop.f32.mrf.mxu3 }
 0x134   :  { %v792_v19 = vmax.f32 %v759_v17, 0.0 }
 0x136   :  { %1315 = vmatmul.msk.f32.gmra.mxu2 %vm107_vm0, %v792_v19 }
 0x139   :  { %v761_v21 = vpop.f32.mrf.mxu0 }
 0x13a   :  { %v762_v22 = vadd.f32 %v2010_v34, %v761_v21  ;;  %1307 = vmatmul.msk.f32.gmra.mxu1 %vm837_vm1, %v824_v42  ;;  %v2118_v60 = vpop.f32.mrf.mxu3 }
 0x13c   :  { %v793_v23 = vmax.f32 %v762_v22, 0.0 }
 0x13d   :  { %v903_v46 = vpop.f32.mrf.mxu1 }
 0x13e   :  { %1316 = vmatmul.msk.f32.gmra.mxu2 %vm107_vm0, %v793_v23 }
 0x141   :  { %v764_v25 = vpop.f32.mrf.mxu0 }
 0x142   :  { %v765_v26 = vadd.f32 %v2010_v34, %v764_v25  ;;  %v2122_v63 = vpop.f32.mrf.mxu3 }
 0x144   :  { %v794_v27 = vmax.f32 %v765_v26, 0.0 }
 0x146   :  { %1317 = vmatmul.msk.f32.gmra.mxu2 %vm107_vm0, %v794_v27 }
 0x147   :  { %v906_v50 = vpop.f32.mrf.mxu1 }
 0x149   :  { %v767_v29 = vpop.f32.mrf.mxu0 }
 0x14a   :  { %v768_v31 = vadd.f32 %v2010_v34, %v767_v29  ;;  %v2126_v2 = vpop.f32.mrf.mxu3 }
 0x14c   :  { %v795_v33 = vmax.f32 %v768_v31, 0.0 }
 0x14e   :  { %1318 = vmatmul.msk.f32.gmra.mxu2 %vm107_vm0, %v795_v33 }
 0x14f   :  { %v909_v55 = vpop.f32.mrf.mxu1 }
 0x151   :  { %v770_v36 = vpop.f32.mrf.mxu0 }
 0x152   :  { %v771_v37 = vadd.f32 %v2010_v34, %v770_v36  ;;  %v2132_v8 = vpop.f32.mrf.mxu3 }
 0x154   :  { %v796_v38 = vmax.f32 %v771_v37, 0.0 }
 0x156   :  { %1319 = vmatmul.msk.f32.gmra.mxu2 %vm107_vm0, %v796_v38 }
 0x157   :  { %v912_v57 = vpop.f32.mrf.mxu1 }
 0x159   :  { %v773_v40 = vpop.f32.mrf.mxu0 }
 0x15a   :  { %v774_v41 = vadd.f32 %v2010_v34, %v773_v40  ;;  %v2136_v12 = vpop.f32.mrf.mxu3 }
 0x15c   :  { %v797_v43 = vmax.f32 %v774_v41, 0.0 }
 0x15e   :  { %1320 = vmatmul.msk.f32.gmra.mxu2 %vm107_vm0, %v797_v43 }
 0x15f   :  { %v915_v62 = vpop.f32.mrf.mxu1 }
 0x161   :  { %v776_v44 = vpop.f32.mrf.mxu0 }
 0x162   :  { %v777_v45 = vadd.f32 %v2010_v34, %v776_v44  ;;  %v620_v16 = vpop.f32.mrf.mxu3 }
 0x164   :  { %v798_v6 = vmax.f32 %v777_v45, 0.0 }
 0x166   :  { %1321 = vmatmul.msk.f32.gmra.mxu2 %vm107_vm0, %v798_v6 }
 0x167   :  { %v918_v1 = vpop.f32.mrf.mxu1 }
 0x169   :  { %v779_v48 = vpop.f32.mrf.mxu0 }
 0x16a   :  { %v780_v49 = vadd.f32 %v2010_v34, %v779_v48  ;;  %v623_v21 = vpop.f32.mrf.mxu3 }
 0x16c   :  { %v799_v51 = vmax.f32 %v780_v49, 0.0  ;;  %v2143_v49 = vld [vmem:[%s2213_s14] ss:$0 sm:$0xff] }
 0x16e   :  { %1322 = vmatmul.msk.f32.gmra.mxu2 %vm107_vm0, %v799_v51 }
 0x16f   :  { %v921_v32 = vpop.f32.mrf.mxu1 }
 0x171   :  { %v782_v53 = vpop.f32.mrf.mxu0 }
 0x172   :  { %v783_v54 = vadd.f32 %v2010_v34, %v782_v53  ;;  %v626_v27 = vpop.f32.mrf.mxu3 }
 0x174   :  { %v800_v18 = vmax.f32 %v783_v54, 0.0 }
 0x176   :  { %1323 = vmatmul.msk.f32.gmra.mxu2 %vm107_vm0, %v800_v18 }
 0x177   :  { %v924_v9 = vpop.f32.mrf.mxu1 }
 0x17a   :  { %v629_v31 = vpop.f32.mrf.mxu3 }
 0x17f   :  { %v927_v14 = vpop.f32.mrf.mxu1 }
 0x181   :  { %v1016_v58 = vpop.f32.mrf.mxu2 }
 0x182   :  { %v2116_v59 = vadd.f32 %v1016_v58, %v903_v46  ;;  %v632_v36 = vpop.f32.mrf.mxu3 }
 0x187   :  { %v930_v20 = vpop.f32.mrf.mxu1 }
 0x189   :  { %v1019_v61 = vpop.f32.mrf.mxu2 }
 0x18a   :  { %v2120_v30 = vadd.f32 %v1019_v61, %v906_v50  ;;  %v635_v39 = vpop.f32.mrf.mxu3 }
 0x18f   :  { %v933_v24 = vpop.f32.mrf.mxu1 }
 0x191   :  { %v1022_v0 = vpop.f32.mrf.mxu2 }
 0x192   :  { %v2124_v34 = vadd.f32 %v1022_v0, %v909_v55  ;;  %v638_v42 = vpop.f32.mrf.mxu3 }
 0x197   :  { %v936_v28 = vpop.f32.mrf.mxu1 }
 0x199   :  { %v1025_v3 = vpop.f32.mrf.mxu2 }
 0x19a   :  { %v2128_v4 = vadd.f32 %v1025_v3, %v912_v57  ;;  %v641_v48 = vpop.f32.mrf.mxu3 }
 0x19f   :  { %v939_v35 = vpop.f32.mrf.mxu1 }
 0x1a1   :  { %v1028_v5 = vpop.f32.mrf.mxu2 }
 0x1a2   :  { %v2130_v7 = vadd.f32 %v1028_v5, %v915_v62 }
 0x1a7   :  { %v942_v38 = vpop.f32.mrf.mxu1 }
 0x1a9   :  { %v1031_v10 = vpop.f32.mrf.mxu2 }
 0x1aa   :  { %v2134_v11 = vadd.f32 %v1031_v10, %v918_v1 }
 0x1af   :  { %v945_v41 = vpop.f32.mrf.mxu1 }
 0x1b1   :  { %v1034_v13 = vpop.f32.mrf.mxu2 }
 0x1b2   :  { %v2138_v15 = vadd.f32 %v1034_v13, %v921_v32 }
 0x1b7   :  { %v948_v44 = vpop.f32.mrf.mxu1 }
 0x1b9   :  { %v1037_v17 = vpop.f32.mrf.mxu2 }
 0x1ba   :  { %v1038_v19 = vadd.f32 %v1037_v17, %v924_v9 }
 0x1c1   :  { %v1040_v22 = vpop.f32.mrf.mxu2 }
 0x1c2   :  { %v1041_v23 = vadd.f32 %v1040_v22, %v927_v14 }
 0x1c9   :  { %v1043_v25 = vpop.f32.mrf.mxu2 }
 0x1ca   :  { %v1044_v26 = vadd.f32 %v1043_v25, %v930_v20  ;;  %v1072_v25 = vadd.f32 %v1041_v23, %v620_v16  ;;  %v1069_v16 = vadd.f32 %v2134_v11, %v2126_v2  ;;  %v1067_v2 = vadd.f32 %v2128_v4, %v2118_v60 }
 0x1cb   :  { %v1064_v60 = vadd.f32 %v2116_v59, %v2106_v47 }
 0x1cc   :  { %v1073_v17 = vadd.f32 %v1044_v26, %v623_v21  ;;  %v1070_v21 = vadd.f32 %v2138_v15, %v2132_v8  ;;  %v1068_v8 = vadd.f32 %v2130_v7, %v2122_v63  ;;  %v1089_v15 = vadd.f32 %v2143_v49, %v1069_v16 }
 0x1cd   :  { %v1065_v63 = vadd.f32 %v2120_v30, %v2110_v52  ;;  %v1116_v52 = vld [vmem:[%s2214_s15] sm:$0x1] }
 0x1ce   :  { %v1090_v23 = vadd.f32 %v2143_v49, %v1070_v21  ;;  %v1088_v11 = vadd.f32 %v2143_v49, %v1068_v8 }
 0x1cf   :  { %v1085_v4 = vadd.f32 %v2143_v49, %v1065_v63 }
 0x1d1   :  { %v1046_v29 = vpop.f32.mrf.mxu2 }
 0x1d2   :  { %v1047_v3 = vadd.f32 %v1046_v29, %v933_v24  ;;  %v1093_v24 = vadd.f32 %v2143_v49, %v1073_v17  ;;  %v1071_v29 = vadd.f32 %v1038_v19, %v2136_v12  ;;  %v1117_v12 = vld [vmem:[#allocation2] sm:$0x1]  ;;  %v1397_v19 = vmov 0  }
 0x1d3   :  { %1367 = vset.pattern.permute.xlu0 %v1397_v19 }
 0x1d4   :  { %v1074_v10 = vadd.f32 %v1047_v3, %v626_v27  ;;  %v1092_v27 = vadd.f32 %v2143_v49, %v1072_v25  ;;  %v1091_v26 = vadd.f32 %v2143_v49, %v1071_v29  ;;  %1120 = vperm.xlu0 %1367, %v1117_v12  }
 0x1d6   :  { %v1094_v20 = vadd.f32 %v2143_v49, %v1074_v10 }
 0x1d9   :  { %v1049_v33 = vpop.f32.mrf.mxu2 }
 0x1da   :  { %v1050_v61 = vadd.f32 %v1049_v33, %v936_v28  ;;  %v1110_v28 = vmax.f32 %v1094_v20, 0.0  ;;  %v1108_v33 = vmax.f32 %v1092_v27, 0.0 }
 0x1dc   :  { %v1075_v32 = vadd.f32 %v1050_v61, %v629_v31  ;;  %v1109_v31 = vmax.f32 %v1093_v24, 0.0 }
 0x1de   :  { %v1095_v13 = vadd.f32 %v2143_v49, %v1075_v32 }
 0x1e0   :  { %v1111_v22 = vmax.f32 %v1095_v13, 0.0 }
 0x1e1   :  { %v1052_v37 = vpop.f32.mrf.mxu2 }
 0x1e2   :  { %v1053_v18 = vadd.f32 %v1052_v37, %v939_v35  ;;  %v1107_v35 = vmax.f32 %v1091_v26, 0.0  ;;  %v1105_v37 = vmax.f32 %v1089_v15, 0.0 }
 0x1e4   :  { %v1076_v62 = vadd.f32 %v1053_v18, %v632_v36  ;;  %v1106_v36 = vmax.f32 %v1090_v23, 0.0 }
 0x1e6   :  { %v1096_v5 = vadd.f32 %v2143_v49, %v1076_v62 }
 0x1e8   :  { %v1112_v14 = vmax.f32 %v1096_v5, 0.0 }
 0x1e9   :  { %v1055_v40 = vpop.f32.mrf.mxu2 }
 0x1ea   :  { %v1056_v50 = vadd.f32 %v1055_v40, %v942_v38  ;;  %v1066_v38 = vadd.f32 %v2124_v34, %v2114_v56  ;;  %v1104_v40 = vmax.f32 %v1088_v11, 0.0  ;;  %v1084_v56 = vadd.f32 %v2143_v49, %v1064_v60 }
 0x1eb   :  { %v1101_v34 = vmax.f32 %v1085_v4, 0.0 }
 0x1ec   :  { %v1077_v55 = vadd.f32 %v1056_v50, %v635_v39  ;;  %v1087_v39 = vadd.f32 %v2143_v49, %v1067_v2  ;;  %v1086_v7 = vadd.f32 %v2143_v49, %v1066_v38 }
 0x1ee   :  { %v1097_v0 = vadd.f32 %v2143_v49, %v1077_v55 }
 0x1f0   :  { %v1113_v9 = vmax.f32 %v1097_v0, 0.0 }
 0x1f1   :  { %v1058_v43 = vpop.f32.mrf.mxu2 }
 0x1f2   :  { %v1059_v45 = vadd.f32 %v1058_v43, %v945_v41  ;;  %v1103_v41 = vmax.f32 %v1087_v39, 0.0  ;;  %v1100_v43 = vmax.f32 %v1084_v56, 0.0 }
 0x1f4   :  { %v1078_v51 = vadd.f32 %v1059_v45, %v638_v42  ;;  %v1102_v42 = vmax.f32 %v1086_v7, 0.0 }
 0x1f6   :  { %v1098_v57 = vadd.f32 %v2143_v49, %v1078_v51 }
 0x1f8   :  { %v1114_v1 = vmax.f32 %v1098_v57, 0.0 }
 0x1f9   :  { %v1061_v46 = vpop.f32.mrf.mxu2 }
 0x1fa   :  { %v1062_v6 = vadd.f32 %v1061_v46, %v948_v44 }
 0x1fc   :  { %v1079_v53 = vadd.f32 %v1062_v6, %v641_v48 }
 0x1fe   :  { %v1099_v54 = vadd.f32 %v2143_v49, %v1079_v53 }
 0x200   :  { %v1115_v58 = vmax.f32 %v1099_v54, 0.0 }
 0x202   :  { %1324 = vmatpush.xpose.msk.msra.mxu3 %vm107_vm0, %v1115_v58 }
 0x206   :  { %1325 = vmatpush.xpose.msk.msra.mxu3 %vm107_vm0, %v1114_v1 }
 0x20a   :  { %1326 = vmatpush.xpose.msk.msra.mxu3 %vm107_vm0, %v1113_v9 }
 0x20e   :  { %1327 = vmatpush.xpose.msk.msra.mxu3 %vm107_vm0, %v1112_v14 }
 0x212   :  { %1328 = vmatpush.xpose.msk.msra.mxu3 %vm107_vm0, %v1111_v22 }
 0x216   :  { %1329 = vmatpush.xpose.msk.msra.mxu3 %vm107_vm0, %v1110_v28 }
 0x21a   :  { %1330 = vmatpush.xpose.msk.msra.mxu3 %vm107_vm0, %v1109_v31 }
 0x21e   :  { %1331 = vmatpush.xpose.msk.msra.mxu3 %vm107_vm0, %v1108_v33 }
 0x222   :  { %1332 = vmatpush.xpose.msk.msra.mxu3 %vm107_vm0, %v1107_v35 }
 0x226   :  { %1333 = vmatpush.xpose.msk.msra.mxu3 %vm107_vm0, %v1106_v36 }
 0x22a   :  { %1334 = vmatpush.xpose.msk.msra.mxu3 %vm107_vm0, %v1105_v37 }
 0x22e   :  { %1335 = vmatpush.xpose.msk.msra.mxu3 %vm107_vm0, %v1104_v40 }
 0x232   :  { %1336 = vmatpush.xpose.msk.msra.mxu3 %vm107_vm0, %v1103_v41 }
 0x236   :  { %1337 = vmatpush.xpose.msk.msra.mxu3 %vm107_vm0, %v1102_v42 }
 0x23a   :  { %1338 = vmatpush.xpose.msk.msra.mxu3 %vm107_vm0, %v1101_v34 }
 0x23e   :  { %1339 = vmatpush.xpose.msk.msra.mxu3 %vm107_vm0, %v1100_v43 }
 0x241   :  { %1340 = vmatmul.msk.f32.vlgmr.msra.gmra.mxu3 %vm107_vm0, %v1116_v52 }
 0x246   :  { %v1121_v47 = vpop.permute.xlu0 %1120 }
 0x247   :  { %v1123_v59 = vperm.slane %v1121_v47, 0 }
 0x2c4   :  { %v1192_v30 = vpop.f32.mrf.mxu3 }
 0x2c5   :  { %v1193_v44 = vadd.f32 %v1192_v30, %v1123_v59 }
 0x2c7   :  { %1195 = vst [vmem:[#allocation3] sm:$0x1] %v1193_v44 }
 0x2c8   :  { %1206 = dma.vmem_to_hbm [thread:$0]  %s1202_s24, 16, %s1204_s12, [#allocation4]  }
 0x2c9   :  { %1395 = dma.done.wait [#allocation4], 16  }
 0x2ca   :  { %1396 = vsyncadd [#allocation4], 4294967280 }
 0x2cb   :  { %1211 = vsyncpa [#allocation4], 1 }

</bundles_post_ra>
